<compile_context>
chip_gen: v7x
topology: tpu7x:2x2x1
jax: 0.10.0
libtpu: 0.0.40
codegen_flags: <defaults>
</compile_context>

<pallas_src>
import functools

import jax
import jax.numpy as jnp
from jax import lax
from jax.experimental import pallas as pl
from jax.experimental.pallas import tpu as pltpu

NEG_BIG = 1e30
LN_EPS = 1e-5
BF16 = jnp.bfloat16
F32 = jnp.float32


# ---------------------------------------------------------------------------
# Fused kernel: grid = (num_layers,), h kept in VMEM scratch across iterations
# ---------------------------------------------------------------------------
def fused_graph_kernel(
    # shared inputs (same block every grid step)
    x_ref, emb_w_ref, emb_b_ref, oh_ref, temb_ref,
    adj_t_ref, head_mask_ref, comb_ref,
    att_w1_ref, att_b1_ref, att_w2_ref, att_b2_ref,
    # per-layer inputs (leading layer dim squeezed by BlockSpec)
    w_ref, acat_ref, bias_ref, gamma_ref, beta_ref,
    # output + scratch
    out_ref, h_vmem,
    *, num_heads, n_nodes):
    l = pl.program_id(0)
    n = n_nodes
    heads = num_heads

    # --- layer-0 prologue: node embedding Linear + node-type embedding ------
    @pl.when(l == 0)
    def _embed():
        h0 = jnp.dot(x_ref[...].astype(BF16), emb_w_ref[...].astype(BF16),
                     preferred_element_type=F32) + emb_b_ref[...]
        # node-type lookup as one-hot @ table (MXU friendly)
        h0 = h0 + jnp.dot(oh_ref[...].astype(BF16), temb_ref[...].astype(BF16),
                          preferred_element_type=F32)
        h_vmem[...] = h0
        out_ref[...] = jnp.zeros_like(out_ref)
        # TODO(synk): nn.Dropout is identity in eval mode; not applied.

    # --- GAT layer l: multi-head dense masked softmax ------------------------
    h = h_vmem[...]                                            # (N, H) f32
    h_bf = h.astype(BF16)
    xp = jnp.dot(h_bf, w_ref[...].astype(BF16),
                 preferred_element_type=F32)                   # (N, H)
    xp_bf = xp.astype(BF16)

    # fused [src | dst] attention projections: (N, 2*heads)
    alpha = jnp.dot(xp_bf, acat_ref[...].astype(BF16),
                    preferred_element_type=F32)
    asrc_t = jnp.transpose(alpha[:, :heads])                   # (heads, N)
    adst = alpha[:, heads:]                                    # (N, heads)

    # e[hd*N + i, j] = a_dst[i, hd] + a_src[j, hd]  (heads stacked on sublanes)
    e = jnp.concatenate(
        [adst[:, hd:hd + 1] + asrc_t[hd:hd + 1, :] for hd in range(heads)],
        axis=0)                                                # (heads*N, N)
    e = jnp.where(e >= 0, e, 0.2 * e)                          # LeakyReLU(0.2)

    # masked softmax over source nodes (lanes); mask hoisted, no per-head work
    adj_t = adj_t_ref[...]                                     # (heads*N, N) 1/0
    m = jnp.max(e + (adj_t - 1.0) * NEG_BIG, axis=-1, keepdims=True)
    p = jnp.exp(e - m) * adj_t                                 # zero non-edges
    denom = jnp.sum(p, axis=-1, keepdims=True)
    attn = p * pl.reciprocal(denom, approx=True)               # (heads*N, N)

    # one lane-dense aggregation matmul for all heads, then head-block select
    z = jnp.dot(attn.astype(BF16), xp_bf,
                preferred_element_type=F32)                    # (heads*N, H)
    z = z * head_mask_ref[...]                                 # keep own head block
    gat = jnp.dot(comb_ref[...], z, preferred_element_type=F32)  # (N, H)
    gat = gat + bias_ref[...]

    # LayerNorm (f32 stats) + residual + ReLU
    mu = jnp.mean(gat, axis=-1, keepdims=True)
    var = jnp.mean((gat - mu) ** 2, axis=-1, keepdims=True)
    norm = (gat - mu) * lax.rsqrt(var + LN_EPS)
    norm = norm * gamma_ref[...] + beta_ref[...]
    h_new = jnp.maximum(norm + h, 0.0)
    h_vmem[...] = h_new
    # TODO(synk): GATConv attention/feature dropout are identity in eval mode.

    # --- last-layer epilogue: global attention readout + mean pool ----------
    @pl.when(l == pl.num_programs(0) - 1)
    def _readout():
        g = jnp.tanh(jnp.dot(h_new.astype(BF16), att_w1_ref[...].astype(BF16),
                             preferred_element_type=F32) + att_b1_ref[...])
        s = jnp.dot(g, att_w2_ref[...], preferred_element_type=F32) + att_b2_ref[...]
        mm = jnp.max(s, axis=0, keepdims=True)
        ps = jnp.exp(s - mm)
        att = ps * pl.reciprocal(jnp.sum(ps, axis=0, keepdims=True), approx=True)
        w_col = att + (1.0 / n)                    # softmax weight + mean pool, fused
        out_ref[...] = jnp.sum(h_new * w_col, axis=0, keepdims=True)


# ---------------------------------------------------------------------------
# Wrapper: single pallas_call for the whole forward
# ---------------------------------------------------------------------------
def graph_network_forward(params, x, onehot, adj_tiled, head_mask, comb, *, num_heads):
    n, _ = x.shape
    hidden = params["emb_w"].shape[1]
    num_layers = params["w_l"].shape[0]

    def shared(arr):
        nd = arr.ndim

        def imap(l):
            return (0,) * nd
        return pl.BlockSpec(tuple(arr.shape), imap)

    def per_layer(arr):
        nd = arr.ndim

        def imap(l):
            return (l,) + (0,) * (nd - 1)
        return pl.BlockSpec((None,) + tuple(arr.shape[1:]), imap)

    kernel = functools.partial(fused_graph_kernel, num_heads=num_heads, n_nodes=n)

    grid_spec = pltpu.PrefetchScalarGridSpec(
        num_scalar_prefetch=0,
        grid=(num_layers,),
        in_specs=[
            shared(x), shared(params["emb_w"]), shared(params["emb_b"]),
            shared(onehot), shared(params["type_emb"]),
            shared(adj_tiled), shared(head_mask), shared(comb),
            shared(params["att_w1"]), shared(params["att_b1"]),
            shared(params["att_w2"]), shared(params["att_b2"]),
            per_layer(params["w_l"]), per_layer(params["acat_l"]),
            per_layer(params["bias_l"]), per_layer(params["gamma_l"]),
            per_layer(params["beta_l"]),
        ],
        out_specs=pl.BlockSpec((1, hidden), lambda l: (0, 0)),
        scratch_shapes=[pltpu.VMEM((n, hidden), jnp.float32)],
    )

    return pl.pallas_call(
        kernel,
        out_shape=jax.ShapeDtypeStruct((1, hidden), jnp.float32),
        grid_spec=grid_spec,
        compiler_params=pltpu.CompilerParams(
            dimension_semantics=("arbitrary",)),
    )(x, params["emb_w"], params["emb_b"], onehot, params["type_emb"],
      adj_tiled, head_mask, comb,
      params["att_w1"], params["att_b1"], params["att_w2"], params["att_b2"],
      params["w_l"], params["acat_l"], params["bias_l"],
      params["gamma_l"], params["beta_l"])


# ---------------------------------------------------------------------------
# Deterministic parameter / constant construction (synthetic, PyTorch shapes)
# ---------------------------------------------------------------------------
def _head_selector(a, hidden, heads, out_c):
    """(hidden, heads) matrix M with M[h*oc:(h+1)*oc, h] = a[h, :] so that
    (x' @ M)[n, h] = sum_c x'[n, h*oc + c] * a[h, c]."""
    m = jnp.zeros((hidden, heads), jnp.float32)
    for hd in range(heads):
        m = m.at[hd * out_c:(hd + 1) * out_c, hd].set(a[hd])
    return m


def init_params(key, in_dim, hidden, num_layers, num_heads, num_node_types):
    out_c = hidden // num_heads
    keys = jax.random.split(key, 8 + 4 * num_layers)
    k = iter(keys)

    def rnd(kk, shape, scale=0.1):
        return (scale * jax.random.normal(kk, shape)).astype(jnp.float32)

    params = {
        "emb_w": rnd(next(k), (in_dim, hidden)),
        "emb_b": rnd(next(k), (1, hidden)),
        "type_emb": rnd(next(k), (num_node_types, hidden)),
        "att_w1": rnd(next(k), (hidden, hidden)),
        "att_b1": rnd(next(k), (1, hidden)),
        "att_w2": rnd(next(k), (hidden, 1)),
        "att_b2": rnd(next(k), (1, 1)),
    }
    w_l, acat_l, bias_l, gamma_l, beta_l = [], [], [], [], []
    for _ in range(num_layers):
        a_src = rnd(next(k), (num_heads, out_c))
        a_dst = rnd(next(k), (num_heads, out_c))
        w_l.append(rnd(next(k), (hidden, hidden)))              # GAT lin (transposed)
        acat_l.append(jnp.concatenate(
            [_head_selector(a_src, hidden, num_heads, out_c),
             _head_selector(a_dst, hidden, num_heads, out_c)], axis=1))
        bias_l.append(rnd(next(k), (1, hidden)))
        gamma_l.append(jnp.ones((1, hidden), jnp.float32))       # LayerNorm weight
        beta_l.append(jnp.zeros((1, hidden), jnp.float32))       # LayerNorm bias
    params["w_l"] = jnp.stack(w_l)
    params["acat_l"] = jnp.stack(acat_l)
    params["bias_l"] = jnp.stack(bias_l)
    params["gamma_l"] = jnp.stack(gamma_l)
    params["beta_l"] = jnp.stack(beta_l)
    return params


def build_adjacency(edge_index, num_nodes):
    """Dense mask adj[target, source] = 1 for every edge (+ self loops)."""
    adj = jnp.zeros((num_nodes, num_nodes), jnp.float32)
    adj = adj.at[edge_index[1], edge_index[0]].set(1.0)
    adj = adj.at[jnp.arange(num_nodes), jnp.arange(num_nodes)].set(1.0)
    return adj


def build_head_constants(num_nodes, hidden, num_heads):
    """head_mask[hd*N+i, hd*oc:(hd+1)*oc] = 1; comb[i, hd*N+i] = 1."""
    out_c = hidden // num_heads
    head_mask = jnp.zeros((num_heads * num_nodes, hidden), jnp.float32)
    comb = jnp.zeros((num_nodes, num_heads * num_nodes), jnp.float32)
    idx = jnp.arange(num_nodes)
    for hd in range(num_heads):
        head_mask = head_mask.at[hd * num_nodes:(hd + 1) * num_nodes,
                                 hd * out_c:(hd + 1) * out_c].set(1.0)
        comb = comb.at[idx, hd * num_nodes + idx].set(1.0)
    return head_mask, comb


if __name__ == "__main__":
    N_NODES = 16
    IN_DIM = 16
    HIDDEN = 32
    NUM_LAYERS = 2
    NUM_HEADS = 4
    NUM_NODE_TYPES = 5

    key = jax.random.PRNGKey(0)
    k_x, k_t, k_p = jax.random.split(key, 3)

    # Node features
    x = jax.random.normal(k_x, (N_NODES, IN_DIM), jnp.float32)

    # Ring graph (both directions), edge_index[0]=source, edge_index[1]=target
    src = jnp.concatenate([jnp.arange(N_NODES), (jnp.arange(N_NODES) + 1) % N_NODES])
    dst = jnp.concatenate([(jnp.arange(N_NODES) + 1) % N_NODES, jnp.arange(N_NODES)])
    edge_index = jnp.stack([src, dst]).astype(jnp.int32)
    adj = build_adjacency(edge_index, N_NODES)
    adj_tiled = jnp.tile(adj, (NUM_HEADS, 1))            # (heads*N, N), hoisted per-head mask

    # Node types (one-hot, consumed as a matmul inside the kernel)
    node_types = jax.random.randint(k_t, (N_NODES,), 0, NUM_NODE_TYPES)
    node_type_onehot = jax.nn.one_hot(node_types, NUM_NODE_TYPES, dtype=jnp.float32)

    head_mask, comb = build_head_constants(N_NODES, HIDDEN, NUM_HEADS)
    params = init_params(k_p, IN_DIM, HIDDEN, NUM_LAYERS, NUM_HEADS, NUM_NODE_TYPES)

    out = graph_network_forward(params, x, node_type_onehot, adj_tiled, head_mask, comb,
                                num_heads=NUM_HEADS)
    out = jax.block_until_ready(out)

    assert out.shape == (1, HIDDEN), out.shape
    assert bool(jnp.all(jnp.isfinite(out)))
    print("KERNEL_OK")
</pallas_src>

<mosaic_0001>
module attributes {stable_mosaic.version = 11 : i64} {
  func.func @fused_graph_kernel(%arg0: i32, %arg1: memref<16x16xf32, #tpu.memory_space<vmem>>, %arg2: memref<16x32xf32, #tpu.memory_space<vmem>>, %arg3: memref<1x32xf32, #tpu.memory_space<vmem>>, %arg4: memref<16x5xf32, #tpu.memory_space<vmem>>, %arg5: memref<5x32xf32, #tpu.memory_space<vmem>>, %arg6: memref<64x16xf32, #tpu.memory_space<vmem>>, %arg7: memref<64x32xf32, #tpu.memory_space<vmem>>, %arg8: memref<16x64xf32, #tpu.memory_space<vmem>>, %arg9: memref<32x32xf32, #tpu.memory_space<vmem>>, %arg10: memref<1x32xf32, #tpu.memory_space<vmem>>, %arg11: memref<32x1xf32, #tpu.memory_space<vmem>>, %arg12: memref<1x1xf32, #tpu.memory_space<vmem>>, %arg13: memref<1x32x32xf32, #tpu.memory_space<vmem>>, %arg14: memref<1x32x8xf32, #tpu.memory_space<vmem>>, %arg15: memref<1x1x32xf32, #tpu.memory_space<vmem>>, %arg16: memref<1x1x32xf32, #tpu.memory_space<vmem>>, %arg17: memref<1x1x32xf32, #tpu.memory_space<vmem>>, %arg18: memref<1x32xf32, #tpu.memory_space<vmem>>, %arg19: memref<16x32xf32, #tpu.memory_space<vmem>>) attributes {dimension_semantics = [#tpu.dimension_semantics<arbitrary>], iteration_bounds = array<i64: 2>, scalar_prefetch = 0 : i64, scratch_operands = 1 : i64, tpu.core_type = #tpu.core_type<tc>, window_params = [{pipeline_mode = #tpu.pipeline_mode<synchronous>, transform_indices = @transform_0, window_bounds = array<i64: 16, 16>}, {pipeline_mode = #tpu.pipeline_mode<synchronous>, transform_indices = @transform_1, window_bounds = array<i64: 16, 32>}, {pipeline_mode = #tpu.pipeline_mode<synchronous>, transform_indices = @transform_2, window_bounds = array<i64: 1, 32>}, {pipeline_mode = #tpu.pipeline_mode<synchronous>, transform_indices = @transform_3, window_bounds = array<i64: 16, 5>}, {pipeline_mode = #tpu.pipeline_mode<synchronous>, transform_indices = @transform_4, window_bounds = array<i64: 5, 32>}, {pipeline_mode = #tpu.pipeline_mode<synchronous>, transform_indices = @transform_5, window_bounds = array<i64: 64, 16>}, {pipeline_mode = #tpu.pipeline_mode<synchronous>, transform_indices = @transform_6, window_bounds = array<i64: 64, 32>}, {pipeline_mode = #tpu.pipeline_mode<synchronous>, transform_indices = @transform_7, window_bounds = array<i64: 16, 64>}, {pipeline_mode = #tpu.pipeline_mode<synchronous>, transform_indices = @transform_8, window_bounds = array<i64: 32, 32>}, {pipeline_mode = #tpu.pipeline_mode<synchronous>, transform_indices = @transform_9, window_bounds = array<i64: 1, 32>}, {pipeline_mode = #tpu.pipeline_mode<synchronous>, transform_indices = @transform_10, window_bounds = array<i64: 32, 1>}, {pipeline_mode = #tpu.pipeline_mode<synchronous>, transform_indices = @transform_11, window_bounds = array<i64: 1, 1>}, {transform_indices = @transform_12, window_bounds = array<i64: 1, 32, 32>}, {transform_indices = @transform_13, window_bounds = array<i64: 1, 32, 8>}, {transform_indices = @transform_14, window_bounds = array<i64: 1, 1, 32>}, {transform_indices = @transform_15, window_bounds = array<i64: 1, 1, 32>}, {transform_indices = @transform_16, window_bounds = array<i64: 1, 1, 32>}, {pipeline_mode = #tpu.pipeline_mode<synchronous>, transform_indices = @transform_17, window_bounds = array<i64: 1, 32>}]} {
    %c0_i32 = arith.constant 0 : i32
    %0 = arith.cmpi eq, %arg0, %c0_i32 : i32
    %1 = arith.extui %0 : i1 to i32
    %c0_i32_0 = arith.constant 0 : i32
    %2 = arith.cmpi ne, %1, %c0_i32_0 : i32
    scf.if %2 {
      %c0_41 = arith.constant 0 : index
      %c0_42 = arith.constant 0 : index
      %103 = vector.load %arg1[%c0_41, %c0_42] : memref<16x16xf32, #tpu.memory_space<vmem>>, vector<16x16xf32>
      %104 = arith.truncf %103 : vector<16x16xf32> to vector<16x16xbf16>
      %c0_43 = arith.constant 0 : index
      %c0_44 = arith.constant 0 : index
      %105 = vector.load %arg2[%c0_43, %c0_44] : memref<16x32xf32, #tpu.memory_space<vmem>>, vector<16x32xf32>
      %106 = arith.truncf %105 : vector<16x32xf32> to vector<16x32xbf16>
      %cst_45 = arith.constant dense<0.000000e+00> : vector<16x32xf32>
      %107 = tpu.matmul %104, %106, %cst_45 {dimension_numbers = #tpu.dot_dimension_numbers<[1], [0], [0], [1], [0, 0, 1, 1], [], []>} : vector<16x16xbf16>, vector<16x32xbf16>, vector<16x32xf32> -> vector<16x32xf32>
      %c0_46 = arith.constant 0 : index
      %c0_47 = arith.constant 0 : index
      %108 = vector.load %arg3[%c0_46, %c0_47] : memref<1x32xf32, #tpu.memory_space<vmem>>, vector<1x32xf32>
      %109 = vector.broadcast %108 : vector<1x32xf32> to vector<16x32xf32>
      %110 = arith.addf %107, %109 : vector<16x32xf32>
      %c0_48 = arith.constant 0 : index
      %c0_49 = arith.constant 0 : index
      %111 = vector.load %arg4[%c0_48, %c0_49] : memref<16x5xf32, #tpu.memory_space<vmem>>, vector<16x5xf32>
      %112 = arith.truncf %111 : vector<16x5xf32> to vector<16x5xbf16>
      %c0_50 = arith.constant 0 : index
      %c0_51 = arith.constant 0 : index
      %113 = vector.load %arg5[%c0_50, %c0_51] : memref<5x32xf32, #tpu.memory_space<vmem>>, vector<5x32xf32>
      %114 = arith.truncf %113 : vector<5x32xf32> to vector<5x32xbf16>
      %cst_52 = arith.constant dense<0.000000e+00> : vector<16x32xf32>
      %115 = tpu.matmul %112, %114, %cst_52 {dimension_numbers = #tpu.dot_dimension_numbers<[1], [0], [0], [1], [0, 0, 1, 1], [], []>} : vector<16x5xbf16>, vector<5x32xbf16>, vector<16x32xf32> -> vector<16x32xf32>
      %116 = arith.addf %110, %115 : vector<16x32xf32>
      %c0_53 = arith.constant 0 : index
      %c0_54 = arith.constant 0 : index
      %117 = vector.load %arg19[%c0_53, %c0_54] : memref<16x32xf32, #tpu.memory_space<vmem>>, vector<16x32xf32>
      tpu.vector_store %arg19[%c0_53, %c0_54], %116 {strides = array<i32>} : memref<16x32xf32, #tpu.memory_space<vmem>>, vector<16x32xf32>,
      %cst_55 = arith.constant 0.000000e+00 : f32
      %118 = vector.broadcast %cst_55 : f32 to vector<1x32xf32>
      %c0_56 = arith.constant 0 : index
      %c0_57 = arith.constant 0 : index
      %119 = vector.load %arg18[%c0_56, %c0_57] : memref<1x32xf32, #tpu.memory_space<vmem>>, vector<1x32xf32>
      tpu.vector_store %arg18[%c0_56, %c0_57], %118 {strides = array<i32>} : memref<1x32xf32, #tpu.memory_space<vmem>>, vector<1x32xf32>,
    } else {
    }
    %c0 = arith.constant 0 : index
    %c0_1 = arith.constant 0 : index
    %3 = vector.load %arg19[%c0, %c0_1] : memref<16x32xf32, #tpu.memory_space<vmem>>, vector<16x32xf32>
    %4 = arith.truncf %3 : vector<16x32xf32> to vector<16x32xbf16>
    %c0_2 = arith.constant 0 : index
    %c0_3 = arith.constant 0 : index
    %c0_4 = arith.constant 0 : index
    %5 = vector.load %arg13[%c0_2, %c0_3, %c0_4] : memref<1x32x32xf32, #tpu.memory_space<vmem>>, vector<1x32x32xf32>
    %6 = vector.shape_cast %5 : vector<1x32x32xf32> to vector<32x32xf32>
    %7 = arith.truncf %6 : vector<32x32xf32> to vector<32x32xbf16>
    %cst = arith.constant dense<0.000000e+00> : vector<16x32xf32>
    %8 = tpu.matmul %4, %7, %cst {dimension_numbers = #tpu.dot_dimension_numbers<[1], [0], [0], [1], [0, 0, 1, 1], [], []>} : vector<16x32xbf16>, vector<32x32xbf16>, vector<16x32xf32> -> vector<16x32xf32>
    %9 = arith.truncf %8 : vector<16x32xf32> to vector<16x32xbf16>
    %c0_5 = arith.constant 0 : index
    %c0_6 = arith.constant 0 : index
    %c0_7 = arith.constant 0 : index
    %10 = vector.load %arg14[%c0_5, %c0_6, %c0_7] : memref<1x32x8xf32, #tpu.memory_space<vmem>>, vector<1x32x8xf32>
    %11 = vector.shape_cast %10 : vector<1x32x8xf32> to vector<32x8xf32>
    %12 = arith.truncf %11 : vector<32x8xf32> to vector<32x8xbf16>
    %cst_8 = arith.constant dense<0.000000e+00> : vector<16x8xf32>
    %13 = tpu.matmul %9, %12, %cst_8 {dimension_numbers = #tpu.dot_dimension_numbers<[1], [0], [0], [1], [0, 0, 1, 1], [], []>} : vector<16x32xbf16>, vector<32x8xbf16>, vector<16x8xf32> -> vector<16x8xf32>
    %14 = vector.extract_strided_slice %13 {offsets = [0, 0], sizes = [16, 4], strides = [1, 1]} : vector<16x8xf32> to vector<16x4xf32>
    %15 = tpu.transpose %14, [1, 0] : vector<16x4xf32> -> vector<4x16xf32>
    %16 = vector.extract_strided_slice %13 {offsets = [0, 4], sizes = [16, 4], strides = [1, 1]} : vector<16x8xf32> to vector<16x4xf32>
    %17 = vector.extract_strided_slice %16 {offsets = [0, 0], sizes = [16, 1], strides = [1, 1]} : vector<16x4xf32> to vector<16x1xf32>
    %18 = vector.extract_strided_slice %15 {offsets = [0, 0], sizes = [1, 16], strides = [1, 1]} : vector<4x16xf32> to vector<1x16xf32>
    %19 = vector.broadcast %17 : vector<16x1xf32> to vector<16x16xf32>
    %20 = vector.broadcast %18 : vector<1x16xf32> to vector<16x16xf32>
    %21 = arith.addf %19, %20 : vector<16x16xf32>
    %22 = vector.extract_strided_slice %16 {offsets = [0, 1], sizes = [16, 1], strides = [1, 1]} : vector<16x4xf32> to vector<16x1xf32>
    %23 = vector.extract_strided_slice %15 {offsets = [1, 0], sizes = [1, 16], strides = [1, 1]} : vector<4x16xf32> to vector<1x16xf32>
    %24 = vector.broadcast %22 : vector<16x1xf32> to vector<16x16xf32>
    %25 = vector.broadcast %23 : vector<1x16xf32> to vector<16x16xf32>
    %26 = arith.addf %24, %25 : vector<16x16xf32>
    %27 = vector.extract_strided_slice %16 {offsets = [0, 2], sizes = [16, 1], strides = [1, 1]} : vector<16x4xf32> to vector<16x1xf32>
    %28 = vector.extract_strided_slice %15 {offsets = [2, 0], sizes = [1, 16], strides = [1, 1]} : vector<4x16xf32> to vector<1x16xf32>
    %29 = vector.broadcast %27 : vector<16x1xf32> to vector<16x16xf32>
    %30 = vector.broadcast %28 : vector<1x16xf32> to vector<16x16xf32>
    %31 = arith.addf %29, %30 : vector<16x16xf32>
    %32 = vector.extract_strided_slice %16 {offsets = [0, 3], sizes = [16, 1], strides = [1, 1]} : vector<16x4xf32> to vector<16x1xf32>
    %33 = vector.extract_strided_slice %15 {offsets = [3, 0], sizes = [1, 16], strides = [1, 1]} : vector<4x16xf32> to vector<1x16xf32>
    %34 = vector.broadcast %32 : vector<16x1xf32> to vector<16x16xf32>
    %35 = vector.broadcast %33 : vector<1x16xf32> to vector<16x16xf32>
    %36 = arith.addf %34, %35 : vector<16x16xf32>
    %37 = tpu.concatenate %21, %26, %31, %36 in 0 : vector<16x16xf32>, vector<16x16xf32>, vector<16x16xf32>, vector<16x16xf32> -> vector<64x16xf32>
    %cst_9 = arith.constant 0.000000e+00 : f32
    %38 = vector.broadcast %cst_9 : f32 to vector<64x16xf32>
    %39 = arith.cmpf oge, %37, %38 : vector<64x16xf32>
    %cst_10 = arith.constant 2.000000e-01 : f32
    %40 = vector.broadcast %cst_10 : f32 to vector<64x16xf32>
    %41 = arith.mulf %40, %37 : vector<64x16xf32>
    %42 = arith.select %39, %37, %41 : vector<64x16xi1>, vector<64x16xf32>
    %c0_11 = arith.constant 0 : index
    %c0_12 = arith.constant 0 : index
    %43 = vector.load %arg6[%c0_11, %c0_12] : memref<64x16xf32, #tpu.memory_space<vmem>>, vector<64x16xf32>
    %cst_13 = arith.constant 1.000000e+00 : f32
    %44 = vector.broadcast %cst_13 : f32 to vector<64x16xf32>
    %45 = arith.subf %43, %44 : vector<64x16xf32>
    %cst_14 = arith.constant 1.000000e+30 : f32
    %46 = vector.broadcast %cst_14 : f32 to vector<64x16xf32>
    %47 = arith.mulf %45, %46 : vector<64x16xf32>
    %48 = arith.addf %42, %47 : vector<64x16xf32>
    %cst_15 = arith.constant dense<0xFF800000> : vector<64xf32>
    %49 = vector.multi_reduction <maximumf>, %48, %cst_15 [1] : vector<64x16xf32> to vector<64xf32>
    %50 = vector.shape_cast %49 : vector<64xf32> to vector<64x1xf32>
    %51 = vector.broadcast %50 : vector<64x1xf32> to vector<64x16xf32>
    %52 = arith.subf %42, %51 : vector<64x16xf32>
    %53 = math.exp %52 : vector<64x16xf32>
    %54 = arith.mulf %53, %43 : vector<64x16xf32>
    %cst_16 = arith.constant dense<0.000000e+00> : vector<64xf32>
    %55 = vector.multi_reduction <add>, %54, %cst_16 [1] : vector<64x16xf32> to vector<64xf32>
    %56 = vector.shape_cast %55 : vector<64xf32> to vector<64x1xf32>
    %57 = tpu.reciprocal %56 {approx = true} : vector<64x1xf32> -> vector<64x1xf32>
    %58 = vector.broadcast %57 : vector<64x1xf32> to vector<64x16xf32>
    %59 = arith.mulf %54, %58 : vector<64x16xf32>
    %60 = arith.truncf %59 : vector<64x16xf32> to vector<64x16xbf16>
    %cst_17 = arith.constant dense<0.000000e+00> : vector<64x32xf32>
    %61 = tpu.matmul %60, %9, %cst_17 {dimension_numbers = #tpu.dot_dimension_numbers<[1], [0], [0], [1], [0, 0, 1, 1], [], []>} : vector<64x16xbf16>, vector<16x32xbf16>, vector<64x32xf32> -> vector<64x32xf32>
    %c0_18 = arith.constant 0 : index
    %c0_19 = arith.constant 0 : index
    %62 = vector.load %arg7[%c0_18, %c0_19] : memref<64x32xf32, #tpu.memory_space<vmem>>, vector<64x32xf32>
    %63 = arith.mulf %61, %62 : vector<64x32xf32>
    %c0_20 = arith.constant 0 : index
    %c0_21 = arith.constant 0 : index
    %64 = vector.load %arg8[%c0_20, %c0_21] : memref<16x64xf32, #tpu.memory_space<vmem>>, vector<16x64xf32>
    %cst_22 = arith.constant dense<0.000000e+00> : vector<16x32xf32>
    %65 = tpu.matmul %64, %63, %cst_22 {dimension_numbers = #tpu.dot_dimension_numbers<[1], [0], [0], [1], [0, 0, 1, 1], [], []>} : vector<16x64xf32>, vector<64x32xf32>, vector<16x32xf32> -> vector<16x32xf32>
    %c0_23 = arith.constant 0 : index
    %c0_24 = arith.constant 0 : index
    %c0_25 = arith.constant 0 : index
    %66 = vector.load %arg15[%c0_23, %c0_24, %c0_25] : memref<1x1x32xf32, #tpu.memory_space<vmem>>, vector<1x1x32xf32>
    %67 = vector.shape_cast %66 : vector<1x1x32xf32> to vector<1x32xf32>
    %68 = vector.broadcast %67 : vector<1x32xf32> to vector<16x32xf32>
    %69 = arith.addf %65, %68 : vector<16x32xf32>
    %cst_26 = arith.constant dense<0.000000e+00> : vector<16xf32>
    %70 = vector.multi_reduction <add>, %69, %cst_26 [1] : vector<16x32xf32> to vector<16xf32>
    %71 = vector.shape_cast %70 : vector<16xf32> to vector<16x1xf32>
    %cst_27 = arith.constant 3.200000e+01 : f32
    %72 = vector.broadcast %cst_27 : f32 to vector<16x1xf32>
    %73 = arith.divf %71, %72 : vector<16x1xf32>
    %74 = vector.broadcast %73 : vector<16x1xf32> to vector<16x32xf32>
    %75 = arith.subf %69, %74 : vector<16x32xf32>
    %76 = arith.mulf %75, %75 : vector<16x32xf32>
    %cst_28 = arith.constant dense<0.000000e+00> : vector<16xf32>
    %77 = vector.multi_reduction <add>, %76, %cst_28 [1] : vector<16x32xf32> to vector<16xf32>
    %78 = vector.shape_cast %77 : vector<16xf32> to vector<16x1xf32>
    %cst_29 = arith.constant 3.200000e+01 : f32
    %79 = vector.broadcast %cst_29 : f32 to vector<16x1xf32>
    %80 = arith.divf %78, %79 : vector<16x1xf32>
    %81 = vector.broadcast %73 : vector<16x1xf32> to vector<16x32xf32>
    %82 = arith.subf %69, %81 : vector<16x32xf32>
    %cst_30 = arith.constant 9.99999974E-6 : f32
    %83 = vector.broadcast %cst_30 : f32 to vector<16x1xf32>
    %84 = arith.addf %80, %83 : vector<16x1xf32>
    %85 = math.rsqrt %84 : vector<16x1xf32>
    %86 = vector.broadcast %85 : vector<16x1xf32> to vector<16x32xf32>
    %87 = arith.mulf %82, %86 : vector<16x32xf32>
    %c0_31 = arith.constant 0 : index
    %c0_32 = arith.constant 0 : index
    %c0_33 = arith.constant 0 : index
    %88 = vector.load %arg16[%c0_31, %c0_32, %c0_33] : memref<1x1x32xf32, #tpu.memory_space<vmem>>, vector<1x1x32xf32>
    %89 = vector.shape_cast %88 : vector<1x1x32xf32> to vector<1x32xf32>
    %90 = vector.broadcast %89 : vector<1x32xf32> to vector<16x32xf32>
    %91 = arith.mulf %87, %90 : vector<16x32xf32>
    %c0_34 = arith.constant 0 : index
    %c0_35 = arith.constant 0 : index
    %c0_36 = arith.constant 0 : index
    %92 = vector.load %arg17[%c0_34, %c0_35, %c0_36] : memref<1x1x32xf32, #tpu.memory_space<vmem>>, vector<1x1x32xf32>
    %93 = vector.shape_cast %92 : vector<1x1x32xf32> to vector<1x32xf32>
    %94 = vector.broadcast %93 : vector<1x32xf32> to vector<16x32xf32>
    %95 = arith.addf %91, %94 : vector<16x32xf32>
    %96 = arith.addf %95, %3 : vector<16x32xf32>
    %cst_37 = arith.constant 0.000000e+00 : f32
    %97 = vector.broadcast %cst_37 : f32 to vector<16x32xf32>
    %98 = arith.maximumf %96, %97 : vector<16x32xf32>
    %c0_38 = arith.constant 0 : index
    %c0_39 = arith.constant 0 : index
    %99 = vector.load %arg19[%c0_38, %c0_39] : memref<16x32xf32, #tpu.memory_space<vmem>>, vector<16x32xf32>
    tpu.vector_store %arg19[%c0_38, %c0_39], %98 {strides = array<i32>} : memref<16x32xf32, #tpu.memory_space<vmem>>, vector<16x32xf32>,
    %c1_i32 = arith.constant 1 : i32
    %100 = arith.cmpi eq, %arg0, %c1_i32 : i32
    %101 = arith.extui %100 : i1 to i32
    %c0_i32_40 = arith.constant 0 : i32
    %102 = arith.cmpi ne, %101, %c0_i32_40 : i32
    scf.if %102 {
      %103 = arith.truncf %98 : vector<16x32xf32> to vector<16x32xbf16>
      %c0_41 = arith.constant 0 : index
      %c0_42 = arith.constant 0 : index
      %104 = vector.load %arg9[%c0_41, %c0_42] : memref<32x32xf32, #tpu.memory_space<vmem>>, vector<32x32xf32>
      %105 = arith.truncf %104 : vector<32x32xf32> to vector<32x32xbf16>
      %cst_43 = arith.constant dense<0.000000e+00> : vector<16x32xf32>
      %106 = tpu.matmul %103, %105, %cst_43 {dimension_numbers = #tpu.dot_dimension_numbers<[1], [0], [0], [1], [0, 0, 1, 1], [], []>} : vector<16x32xbf16>, vector<32x32xbf16>, vector<16x32xf32> -> vector<16x32xf32>
      %c0_44 = arith.constant 0 : index
      %c0_45 = arith.constant 0 : index
      %107 = vector.load %arg10[%c0_44, %c0_45] : memref<1x32xf32, #tpu.memory_space<vmem>>, vector<1x32xf32>
      %108 = vector.broadcast %107 : vector<1x32xf32> to vector<16x32xf32>
      %109 = arith.addf %106, %108 : vector<16x32xf32>
      %110 = math.tanh %109 : vector<16x32xf32>
      %c0_46 = arith.constant 0 : index
      %c0_47 = arith.constant 0 : index
      %111 = vector.load %arg11[%c0_46, %c0_47] : memref<32x1xf32, #tpu.memory_space<vmem>>, vector<32x1xf32>
      %cst_48 = arith.constant dense<0.000000e+00> : vector<16x1xf32>
      %112 = tpu.matmul %110, %111, %cst_48 {dimension_numbers = #tpu.dot_dimension_numbers<[1], [0], [0], [1], [0, 0, 1, 1], [], []>} : vector<16x32xf32>, vector<32x1xf32>, vector<16x1xf32> -> vector<16x1xf32>
      %c0_49 = arith.constant 0 : index
      %c0_50 = arith.constant 0 : index
      %113 = vector.load %arg12[%c0_49, %c0_50] : memref<1x1xf32, #tpu.memory_space<vmem>>, vector<1x1xf32>
      %114 = vector.broadcast %113 : vector<1x1xf32> to vector<16x1xf32>
      %115 = arith.addf %112, %114 : vector<16x1xf32>
      %cst_51 = arith.constant dense<0xFF800000> : vector<1xf32>
      %116 = vector.multi_reduction <maximumf>, %115, %cst_51 [0] : vector<16x1xf32> to vector<1xf32>
      %117 = vector.shape_cast %116 : vector<1xf32> to vector<1x1xf32>
      %118 = vector.broadcast %117 : vector<1x1xf32> to vector<16x1xf32>
      %119 = arith.subf %115, %118 : vector<16x1xf32>
      %120 = math.exp %119 : vector<16x1xf32>
      %cst_52 = arith.constant dense<0.000000e+00> : vector<1xf32>
      %121 = vector.multi_reduction <add>, %120, %cst_52 [0] : vector<16x1xf32> to vector<1xf32>
      %122 = vector.shape_cast %121 : vector<1xf32> to vector<1x1xf32>
      %123 = tpu.reciprocal %122 {approx = true} : vector<1x1xf32> -> vector<1x1xf32>
      %124 = vector.broadcast %123 : vector<1x1xf32> to vector<16x1xf32>
      %125 = arith.mulf %120, %124 : vector<16x1xf32>
      %cst_53 = arith.constant 6.250000e-02 : f32
      %126 = vector.broadcast %cst_53 : f32 to vector<16x1xf32>
      %127 = arith.addf %125, %126 : vector<16x1xf32>
      %128 = vector.broadcast %127 : vector<16x1xf32> to vector<16x32xf32>
      %129 = arith.mulf %98, %128 : vector<16x32xf32>
      %cst_54 = arith.constant dense<0.000000e+00> : vector<32xf32>
      %130 = vector.multi_reduction <add>, %129, %cst_54 [0] : vector<16x32xf32> to vector<32xf32>
      %131 = vector.shape_cast %130 : vector<32xf32> to vector<1x32xf32>
      %c0_55 = arith.constant 0 : index
      %c0_56 = arith.constant 0 : index
      %132 = vector.load %arg18[%c0_55, %c0_56] : memref<1x32xf32, #tpu.memory_space<vmem>>, vector<1x32xf32>
      tpu.vector_store %arg18[%c0_55, %c0_56], %131 {strides = array<i32>} : memref<1x32xf32, #tpu.memory_space<vmem>>, vector<1x32xf32>,
    } else {
    }
    return
  }
  func.func @transform_0(%arg0: i32) -> (i32, i32) {
    %c0_i32 = arith.constant 0 : i32
    %c0_i32_0 = arith.constant 0 : i32
    %c0_i32_1 = arith.constant 0 : i32
    return %c0_i32, %c0_i32_0 : i32, i32
  }
  func.func @transform_1(%arg0: i32) -> (i32, i32) {
    %c0_i32 = arith.constant 0 : i32
    %c0_i32_0 = arith.constant 0 : i32
    %c0_i32_1 = arith.constant 0 : i32
    return %c0_i32, %c0_i32_0 : i32, i32
  }
  func.func @transform_2(%arg0: i32) -> (i32, i32) {
    %c0_i32 = arith.constant 0 : i32
    %c0_i32_0 = arith.constant 0 : i32
    %c0_i32_1 = arith.constant 0 : i32
    return %c0_i32, %c0_i32_0 : i32, i32
  }
  func.func @transform_3(%arg0: i32) -> (i32, i32) {
    %c0_i32 = arith.constant 0 : i32
    %c0_i32_0 = arith.constant 0 : i32
    %c0_i32_1 = arith.constant 0 : i32
    return %c0_i32, %c0_i32_0 : i32, i32
  }
  func.func @transform_4(%arg0: i32) -> (i32, i32) {
    %c0_i32 = arith.constant 0 : i32
    %c0_i32_0 = arith.constant 0 : i32
    %c0_i32_1 = arith.constant 0 : i32
    return %c0_i32, %c0_i32_0 : i32, i32
  }
  func.func @transform_5(%arg0: i32) -> (i32, i32) {
    %c0_i32 = arith.constant 0 : i32
    %c0_i32_0 = arith.constant 0 : i32
    %c0_i32_1 = arith.constant 0 : i32
    return %c0_i32, %c0_i32_0 : i32, i32
  }
  func.func @transform_6(%arg0: i32) -> (i32, i32) {
    %c0_i32 = arith.constant 0 : i32
    %c0_i32_0 = arith.constant 0 : i32
    %c0_i32_1 = arith.constant 0 : i32
    return %c0_i32, %c0_i32_0 : i32, i32
  }
  func.func @transform_7(%arg0: i32) -> (i32, i32) {
    %c0_i32 = arith.constant 0 : i32
    %c0_i32_0 = arith.constant 0 : i32
    %c0_i32_1 = arith.constant 0 : i32
    return %c0_i32, %c0_i32_0 : i32, i32
  }
  func.func @transform_8(%arg0: i32) -> (i32, i32) {
    %c0_i32 = arith.constant 0 : i32
    %c0_i32_0 = arith.constant 0 : i32
    %c0_i32_1 = arith.constant 0 : i32
    return %c0_i32, %c0_i32_0 : i32, i32
  }
  func.func @transform_9(%arg0: i32) -> (i32, i32) {
    %c0_i32 = arith.constant 0 : i32
    %c0_i32_0 = arith.constant 0 : i32
    %c0_i32_1 = arith.constant 0 : i32
    return %c0_i32, %c0_i32_0 : i32, i32
  }
  func.func @transform_10(%arg0: i32) -> (i32, i32) {
    %c0_i32 = arith.constant 0 : i32
    %c0_i32_0 = arith.constant 0 : i32
    %c0_i32_1 = arith.constant 0 : i32
    return %c0_i32, %c0_i32_0 : i32, i32
  }
  func.func @transform_11(%arg0: i32) -> (i32, i32) {
    %c0_i32 = arith.constant 0 : i32
    %c0_i32_0 = arith.constant 0 : i32
    %c0_i32_1 = arith.constant 0 : i32
    return %c0_i32, %c0_i32_0 : i32, i32
  }
  func.func @transform_12(%arg0: i32) -> (i32, i32, i32) {
    %c0_i32 = arith.constant 0 : i32
    %c0_i32_0 = arith.constant 0 : i32
    %c0_i32_1 = arith.constant 0 : i32
    return %arg0, %c0_i32, %c0_i32_0 : i32, i32, i32
  }
  func.func @transform_13(%arg0: i32) -> (i32, i32, i32) {
    %c0_i32 = arith.constant 0 : i32
    %c0_i32_0 = arith.constant 0 : i32
    %c0_i32_1 = arith.constant 0 : i32
    return %arg0, %c0_i32, %c0_i32_0 : i32, i32, i32
  }
  func.func @transform_14(%arg0: i32) -> (i32, i32, i32) {
    %c0_i32 = arith.constant 0 : i32
    %c0_i32_0 = arith.constant 0 : i32
    %c0_i32_1 = arith.constant 0 : i32
    return %arg0, %c0_i32, %c0_i32_0 : i32, i32, i32
  }
  func.func @transform_15(%arg0: i32) -> (i32, i32, i32) {
    %c0_i32 = arith.constant 0 : i32
    %c0_i32_0 = arith.constant 0 : i32
    %c0_i32_1 = arith.constant 0 : i32
    return %arg0, %c0_i32, %c0_i32_0 : i32, i32, i32
  }
  func.func @transform_16(%arg0: i32) -> (i32, i32, i32) {
    %c0_i32 = arith.constant 0 : i32
    %c0_i32_0 = arith.constant 0 : i32
    %c0_i32_1 = arith.constant 0 : i32
    return %arg0, %c0_i32, %c0_i32_0 : i32, i32, i32
  }
  func.func @transform_17(%arg0: i32) -> (i32, i32) {
    %c0_i32 = arith.constant 0 : i32
    %c0_i32_0 = arith.constant 0 : i32
    %c0_i32_1 = arith.constant 0 : i32
    return %c0_i32, %c0_i32_0 : i32, i32
  }
}

</mosaic_0001>

<bundles_post_ra>
// kernel: tpu_custom_call.1
= control target key start
LH: loop header
LB: loop body
LE: loop exit
PB: predicated region body
PF: predicated region fallthrough
CT: control target
= control target key end

     0   :  { %s2299_s0 = inlined_call_operand.vmem [shape: f32[16,16], index: 0, kind: input, shape index: {}]   ;;  %s2300_s1 = inlined_call_operand.vmem [shape: f32[16,32], index: 1, kind: input, shape index: {}]   ;;  %s2301_s2 = inlined_call_operand.vmem [shape: f32[1,32], index: 2, kind: input, shape index: {}]   ;;  %s2302_s3 = inlined_call_operand.vmem [shape: f32[16,5], index: 3, kind: input, shape index: {}]   ;;  %s2303_s4 = inlined_call_operand.vmem [shape: f32[5,32], index: 4, kind: input, shape index: {}]   ;;  %s2304_s5 = inlined_call_operand.vmem [shape: f32[64,16], index: 5, kind: input, shape index: {}]   ;;  %s2305_s6 = inlined_call_operand.vmem [shape: f32[64,32], index: 6, kind: input, shape index: {}]   ;;  %s2306_s7 = inlined_call_operand.vmem [shape: f32[16,64], index: 7, kind: input, shape index: {}]   ;;  %s2307_s8 = inlined_call_operand.vmem [shape: f32[32,32], index: 8, kind: input, shape index: {}]   ;;  %s2308_s9 = inlined_call_operand.vmem [shape: f32[1,32], index: 9, kind: input, shape index: {}]   ;;  %s2309_s10 = inlined_call_operand.vmem [shape: f32[32,1], index: 10, kind: input, shape index: {}]   ;;  %s2310_s11 = inlined_call_operand.<no memory space> [shape: f32[1,1], index: 11, kind: input, shape index: {}]   ;;  %s2311_s12 = inlined_call_operand.vmem [shape: f32[2,32,32], index: 12, kind: input, shape index: {}]   ;;  %s2312_s13 = inlined_call_operand.vmem [shape: f32[2,32,8], index: 13, kind: input, shape index: {}]   ;;  %s2313_s14 = inlined_call_operand.vmem [shape: f32[2,1,32], index: 14, kind: input, shape index: {}]   ;;  %s2314_s15 = inlined_call_operand.vmem [shape: f32[2,1,32], index: 15, kind: input, shape index: {}]   ;;  %s2315_s16 = inlined_call_operand.vmem [shape: f32[2,1,32], index: 16, kind: input, shape index: {}]   ;;  %s2316_s17 = inlined_call_operand.hbm [shape: f32[1,32], index: 17, kind: output, shape index: {}]  }
   0x1   :  { %2321 = sst [smem:[#allocation8_spill]] %s2299_s0  ;;  %v22_v0 = vstv %s2310_s11 }
   0x2   :  { %2322 = sst [smem:[#allocation9_spill]] %s2300_s1  ;;  %23 = vst [vmem:[#allocation3] sm:$0x1] %v22_v0 }
   0x3   :  { %2323 = sst [smem:[#allocation10_spill]] %s2308_s9 }
   0x4   :  { %2324 = sst [smem:[#allocation11_spill]] %s2316_s17 }
   0x5   :  { %24 = vsyncpa [#allocation5], 0  ;;  %s2013_s26 = smov 0  }
   0x6 LB: > { %2325 = sst [smem:[#allocation7_spill]] %s1905_s26  ;;  %s2019_s27 = sadd.s32 4294967295, %s1905_s26   ;;  %s1905_s26 = sphi %s2013_s26, %s30_s26  }
   0x7   : > { %p1610_p0 = scmp.ge.s32.totalorder %s1905_s26, 1  ;;  %p519_p1 = scmp.lt.s32.totalorder %s1905_s26, 3 }
   0x9   : > { %p520_p2 = pnand %p1610_p0, %p519_p1 }
   0xa   : > { %p580_p3 = scmp.lt.s32.totalorder (!%p520_p2), %s2019_s27, 1  ;;  %p1615_p4 = scmp.ne.s32.totalorder (!%p520_p2), %s2019_s27, 0 }
   0xb   : > { %523 = sbr.rel (%p520_p2) target bundleno = 2678 (0xa76), region = 88 }
  0x12   : > { %s2025_s11 = scalar_select %p580_p3, %s2019_s27, 1 }
  0x13   : > { %603 = sbr.rel (%p1615_p4) target bundleno = 251 (0xfb), region = 92  ;;  %vm724_vm0 = vcmask (!%p1615_p4), 253952   ;;  %s2326_s18 = sld [smem:[#allocation9_spill]] (!%p1615_p4)  ;;  %vm671_vm1 = vcmask (!%p1615_p4), 1041408   ;;  %v1907_v3 = vmov (!%p1615_p4), 0.0   ;;  %vm672_vm2 = vcmask (!%p1615_p4), 1042432  }
  0x14   : > { %s1648_s28 = sshll.u32 %s2025_s11, 5  ;;  %s592_s30 = scalar_lea.vmem %s2313_s14, %s2025_s11  ;;  %1684 = vmatprep.subr.bf16.mxu1 (!%p1615_p4), %v1907_v3  ;;  %725 = vst.msk [vmem:[#allocation4] sm:$0x1] (!%p1615_p4), %vm724_vm0, %v1907_v3  ;;  %1690 = vmatprep.subr.bf16.mxu0 (!%p1615_p4), %v1907_v3  ;;  %v665_v5 = vld [vmem:[%s2303_s4] sm:$0x1f] (!%p1615_p4)  ;;  %vm1908_vm3 = vmmov (!%p1615_p4), 0  }
  0x15   : > { %s2035_s1 = scalar_lea.vmem %s2311_s12, %s1648_s28  ;;  %s2040_s22 = scalar_lea.vmem %s2312_s13, %s1648_s28  ;;  %1686 = vmatprep.mubr.msk.bf16.mxu1 (!%p1615_p4), %vm1908_vm3, %v1907_v3  ;;  %v666_v8 = vpack.c.bf16 (!%p1615_p4), %v665_v5, %v665_v5  ;;  %v1909_v9 = vmov (!%p1615_p4), 65535   ;;  %1692 = vmatprep.mubr.msk.bf16.mxu0 (!%p1615_p4), %vm1908_vm3, %v1907_v3  ;;  %v662_v12 = vld [vmem:[%s2302_s3] sm:$0xff] (!%p1615_p4)  ;;  %v663_v13 = vld [vmem:[%s2302_s3 + $0x8] sm:$0xff] (!%p1615_p4)  ;;  %vm617_vm4 = vcmask (!%p1615_p4), 130048   ;;  %vm667_vm5 = vcmask (!%p1615_p4), 39936  }
  0x16   : > { %s595_s25 = scalar_lea.vmem %s2314_s15, %s2025_s11  ;;  %s598_s9 = scalar_lea.vmem %s2315_s16, %s2025_s11  ;;  %v673_v10 = vsel (!%p1615_p4), %vm671_vm1, 4294967295, %v1909_v9  ;;  %v664_v16 = vpack.c.bf16 (!%p1615_p4), %v663_v13, %v662_v12  ;;  %v1616_v17 = vld [vmem:[%s2301_s2] ss:$0 sm:$0xff] (!%p1615_p4)  ;;  %vm721_vm6 = vcmask (!%p1615_p4), 261120  }
  0x17   : > { %s2327_s23 = sld [smem:[#allocation8_spill]] (!%p1615_p4)  ;;  %v674_v14 = vsel (!%p1615_p4), %vm672_vm2, %v673_v10, 0 }
  0x18   : > { %v676_v15 = vand.u32 (!%p1615_p4), %v674_v14, %v666_v8 }
  0x19   : > { %v607_v1 = vld [vmem:[%s2326_s18] sm:$0xff] (!%p1615_p4)  ;;  %v608_v2 = vld [vmem:[%s2326_s18 + $0x8] sm:$0xff] (!%p1615_p4) }
  0x1a   : > { %v609_v4 = vpack.c.bf16 %v608_v2, %v607_v1  ;;  %1691 = vmatpush3.bf16.msra.mxu0 %v676_v15 }
  0x1c   : > { %1685 = vmatpush3.bf16.msra.mxu1 %v609_v4 }
  0x1d   : > { %v604_v6 = vld [vmem:[%s2327_s23] sm:$0xff]  ;;  %v605_v7 = vld [vmem:[%s2327_s23 + $0x8] sm:$0xff]  ;;  %1693 = vmatmul.mubr.msk.bf16.vlgmr.msra.gmra.mrb[0].mxu0 %vm667_vm5, %v664_v16 }
  0x1e   : > { %v606_v11 = vpack.c.bf16 %v605_v7, %v604_v6 }
  0x20   : > { %1687 = vmatmul.mubr.msk.bf16.vlgmr.msra.gmra.mrb[0].mxu1 %vm617_vm4, %v606_v11 }
  0xf0   : > { %v712_v23 = vpop.f32.mrb[0].mxu0 }
  0xf1   : > { %v1694_v26 = vpop.f32.mrb[1].mxu0 }
  0xf2   : > { %v715_v27 = vpop.f32.mrb[2].mxu0 }
  0xf3   : > { %v655_v18 = vpop.f32.mrb[0].mxu1  ;;  %v1695_v29 = vpop.f32.mrb[3].mxu0 }
  0xf4   : > { %v656_v19 = vadd.f32 %v1616_v17, %v655_v18  ;;  %v1688_v20 = vpop.f32.mrb[1].mxu1 }
  0xf5   : > { %v658_v21 = vpop.f32.mrb[2].mxu1 }
  0xf6   : > { %v659_v22 = vadd.f32 %v1616_v17, %v658_v21  ;;  %v1689_v24 = vpop.f32.mrb[3].mxu1  ;;  %v719_v25 = vadd.f32 %v712_v23, %v656_v19 }
  0xf8   : > { %722 = vst.msk [vmem:[#allocation2] sm:$0xff] %vm721_vm6, %v719_v25  ;;  %v720_v28 = vadd.f32 %v715_v27, %v659_v22 }
  0xfa   : > { %723 = vst.msk [vmem:[#allocation2 + $0x8] sm:$0xff] %vm721_vm6, %v720_v28 }
  0xfb PF: > { %v729_v30 = vld [vmem:[%s2035_s1] sm:$0xff]  ;;  %v730_v31 = vld [vmem:[%s2035_s1 + $0x8] sm:$0xff]  ;;  %v731_v32 = vld [vmem:[%s2035_s1 + $0x10] sm:$0xff]  ;;  %v1910_v33 = vmov 0.0   ;;  %vm1911_vm7 = vmmov 0   ;;  %vm735_vm8 = vcmask 261120   ;;  %v873_v61 = vlaneseq }
  0xfc   : > { %1696 = vmatprep.subr.bf16.mxu0 %v1910_v33  ;;  %v733_v34 = vpack.c.bf16 %v730_v31, %v729_v30  ;;  %v732_v35 = vld [vmem:[%s2035_s1 + $0x18] sm:$0xff]  ;;  %1700 = vmatprep.mubr.msk.bf16.mxu0 %vm1911_vm7, %v1910_v33  ;;  %v781_v36 = vld [vmem:[%s2040_s22] sm:$0xff]  ;;  %v782_v37 = vld [vmem:[%s2040_s22 + $0x8] sm:$0xff]  ;;  %v1912_v46 = vmov 5   ;;  %v1913_v47 = vmov 4   ;;  %v1914_v57 = vmov 7  }
  0xfd   : > { %1704 = vmatprep.subr.bf16.mxu1 %v1910_v33  ;;  %1708 = vmatprep.mubr.msk.bf16.mxu1 %vm1911_vm7, %v1910_v33  ;;  %v734_v38 = vpack.c.bf16 %v732_v35, %v731_v32  ;;  %v785_v41 = vpack.c.bf16 %v782_v37, %v781_v36  ;;  %v783_v43 = vld [vmem:[%s2040_s22 + $0x10] sm:$0xff]  ;;  %v784_v44 = vld [vmem:[%s2040_s22 + $0x18] sm:$0xff]  ;;  %v1915_v58 = vmov 6   ;;  %v874_v63 = vshrl.u32 %v873_v61, 7  ;;  %v2099_v5 = vld [vmem:[%s2304_s5] sm:$0xff]  ;;  %p1638_p5 = scmp.ne.s32.totalorder %s2019_s27, 1 }
  0xfe   : > { %1697 = vmatpush3.bf16.msra.mxu0 %v733_v34  ;;  %v786_v45 = vpack.c.bf16 %v784_v44, %v783_v43  ;;  %1816 = vset.pattern.permute.xlu1 %v1912_v46  ;;  %v2094_v4 = vld [vmem:[%s2304_s5 + $0x18] sm:$0xff]  ;;  %v2104_v6 = vld [vmem:[%s2304_s5 + $0x10] sm:$0xff]  ;;  %v2109_v8 = vld [vmem:[%s2304_s5 + $0x8] sm:$0xff]  ;;  %v1621_v12 = vadd.f32 -1.0, %v2099_v5  ;;  %vm977_vm11 = vcmask 130048   ;;  %vm1180_vm2 = vcmask 523264  }
  0xff   : > { %v2081_v39 = vld [vmem:[#allocation2] sm:$0xff]  ;;  %1698 = vmatprep.subr.bf16.mxu0 %v1910_v33  ;;  %1705 = vmatpush3.bf16.msra.mxu1 %v785_v41  ;;  %v875_v2 = vsub.s32 0, %v874_v63  ;;  %v889_v3 = vsub.s32 1, %v874_v63  ;;  %v903_v7 = vsub.s32 2, %v874_v63  ;;  %v1624_v11 = vadd.f32 -1.0, %v2094_v4  ;;  %s2328_s17 = sld [smem:[#allocation10_spill]] (!%p1638_p5) }
 0x100   : > { %1706 = vmatprep.subr.bf16.mxu1 %v1910_v33  ;;  %1815 = vset.pattern.permute.xlu0 %v1913_v47  ;;  %v1623_v13 = vadd.f32 -1.0, %v2104_v6  ;;  %v917_v16 = vsub.s32 3, %v874_v63  ;;  %v1622_v18 = vadd.f32 -1.0, %v2109_v8  ;;  %v961_v24 = vmul.f32 1e+30, %v1621_v12  ;;  %v2118_v31 = vld [vmem:[%s2304_s5 + $0x20] sm:$0xff] }
 0x101   : > { %v2083_v40 = vld [vmem:[#allocation2 + $0x8] sm:$0xff]  ;;  %v964_v23 = vmul.f32 1e+30, %v1624_v11  ;;  %v1625_v41 = vadd.f32 -1.0, %v2118_v31  ;;  %vm1917_vm3 = vmmov (!%p1638_p5), 0   ;;  %vm1469_vm4 = vcmask (!%p1638_p5), 7168  }
 0x102   : > { %v728_v42 = vpack.c.bf16 %v2083_v40, %v2081_v39  ;;  %1699 = vmatpush3.bf16.msra.mxu0 %v734_v38  ;;  %v963_v25 = vmul.f32 1e+30, %v1623_v13  ;;  %vm1520_vm5 = vcmask (!%p1638_p5), 253952  }
 0x103   : > { %1707 = vmatpush3.bf16.msra.mxu1 %v786_v45  ;;  %v962_v45 = vmul.f32 1e+30, %v1622_v18 }
 0x105   : > { %1701 = vmatmul.mubr.msk.bf16.vlgmr.msra.gmra.mrb[0].mxu0 %vm735_vm8, %v728_v42 }
 0x1d8   : > { %v773_v48 = vpop.f32.mrb[0].mxu0 }
 0x1d9   : > { %v1702_v49 = vpop.f32.mrb[1].mxu0 }
 0x1da   : > { %v776_v50 = vpop.f32.mrb[2].mxu0  ;;  %v2129_v49 = vld [vmem:[%s2304_s5 + $0x30] sm:$0xff] }
 0x1db   : > { %v780_v51 = vpack.c.bf16 %v776_v50, %v773_v48  ;;  %v1703_v52 = vpop.f32.mrb[3].mxu0 }
 0x1dc   : > { %v965_v52 = vmul.f32 1e+30, %v1625_v41 }
 0x1dd   : > { %1709 = vmatmul.mubr.msk.bf16.vlgmr.msra.gmra.mrb[0].mxu1 %vm735_vm8, %v780_v51  ;;  %1712 = vmatprep.subr.bf16.mxu0 %v780_v51 }
 0x1de   : > { %1713 = vmatpush3.bf16.msra.mxu0 %v780_v51 }
 0x2b0   : > { %v824_v53 = vpop.f32.mrb[0].mxu1 }
 0x2b1   : > { %880 = vperm.xlu1 %1816, %v824_v53   ;;  %865 = vperm.xlu0 %1815, %v824_v53   ;;  %v1710_v54 = vpop.f32.mrb[1].mxu1 }
 0x2b2   : > { %v827_v55 = vpop.f32.mrb[2].mxu1 }
 0x2b3   : > { %v1711_v56 = vpop.f32.mrb[3].mxu1 }
 0x2b5   : > { %1818 = vset.pattern.permute.xlu1 %v1914_v57  ;;  %870 = vperm.xlu0 %1815, %v827_v55  }
 0x2b6   : > { %908 = vperm.xlu1 %1818, %v824_v53  }
 0x2b9   : > { %1817 = vset.pattern.permute.xlu0 %v1915_v58 }
 0x2ba   : > { %1819 = vset.pattern.permute.xlu1 %v1912_v46  ;;  %894 = vperm.xlu0 %1817, %v824_v53  }
 0x2bb   : > { %884 = vperm.xlu1 %1819, %v827_v55  }
 0x2be   : > { %1821 = vset.pattern.permute.xlu0 %v1914_v57  ;;  %v2136_v57 = vld [vmem:[%s2304_s5 + $0x28] sm:$0xff] }
 0x2bf   : > { %1820 = vset.pattern.permute.xlu1 %v1915_v58  ;;  %912 = vperm.xlu0 %1821, %v827_v55  }
 0x2c0   : > { %898 = vperm.xlu1 %1820, %v827_v55  }
 0x2e9   : > { %831 = vxpose.xlu1.b32.start [1/2] (short) (narrow) %v824_v53, 8  ;;  %v1627_v53 = vadd.f32 -1.0, %v2129_v49 }
 0x2eb   : > { %v967_v61 = vmul.f32 1e+30, %v1627_v53 }
 0x2ed   : > { %832 = vxpose.xlu1.b32.end [2/2] (short) (narrow) %v827_v55, 8 }
 0x330   : > { %v881_v59 = vpop.permute.xlu1 %880  ;;  %v866_v0 = vpop.permute.xlu0 %865 }
 0x334   : > { %v871_v9 = vpop.permute.xlu0 %870 }
 0x335   : > { %v909_v60 = vpop.permute.xlu1 %908 }
 0x339   : > { %v895_v28 = vpop.permute.xlu0 %894 }
 0x33a   : > { %v885_v62 = vpop.permute.xlu1 %884 }
 0x33e   : > { %v913_v58 = vpop.permute.xlu0 %912 }
 0x33f   : > { %v899_v1 = vpop.permute.xlu1 %898 }
 0x369   : > { %v847_v10 = vpop.trf.xlu1 }
 0x36a   : > { %v876_v14 = vrot.slane %v847_v10, %v875_v2  ;;  %v890_v15 = vrot.slane %v847_v10, %v889_v3  ;;  %v904_v17 = vrot.slane %v847_v10, %v903_v7  ;;  %v918_v29 = vrot.slane %v847_v10, %v917_v16  ;;  %v2143_v2 = vld [vmem:[%s2304_s5 + $0x38] sm:$0xff] }
 0x36b   : > { %v1628_v10 = vadd.f32 -1.0, %v2143_v2 }
 0x36c   : > { %v877_v19 = vadd.f32 %v876_v14, %v866_v0  ;;  %v878_v20 = vadd.f32 %v876_v14, %v871_v9  ;;  %v891_v21 = vadd.f32 %v890_v15, %v881_v59  ;;  %v892_v22 = vadd.f32 %v890_v15, %v885_v62 }
 0x36d   : > { %v905_v32 = vadd.f32 %v904_v17, %v895_v28  ;;  %v919_v46 = vadd.f32 %v918_v29, %v909_v60  ;;  %v906_v54 = vadd.f32 %v904_v17, %v899_v1  ;;  %v1626_v62 = vadd.f32 -1.0, %v2136_v57 }
 0x36e   : > { %vm924_vm9 = vcmp.ge.f32.partialorder %v892_v22, 0.0  ;;  %v932_v26 = vmul.f32 0.2, %v892_v22  ;;  %vm921_vm10 = vcmp.ge.f32.partialorder %v877_v19, 0.0  ;;  %v929_v27 = vmul.f32 0.2, %v877_v19 }
 0x36f   : > { %vm923_vm12 = vcmp.ge.f32.partialorder %v891_v21, 0.0  ;;  %v931_v30 = vmul.f32 0.2, %v891_v21  ;;  %v930_v35 = vmul.f32 0.2, %v878_v20  ;;  %vm922_vm13 = vcmp.ge.f32.partialorder %v878_v20, 0.0 }
 0x370   : > { %v2120_v33 = vsel %vm924_vm9, %v892_v22, %v932_v26  ;;  %v937_v34 = vsel %vm921_vm10, %v877_v19, %v929_v27  ;;  %v933_v48 = vmul.f32 0.2, %v905_v32  ;;  %vm925_vm14 = vcmp.ge.f32.partialorder %v905_v32, 0.0 }
 0x371   : > { %v972_v36 = vadd.f32 %v964_v23, %v2120_v33  ;;  %v969_v37 = vadd.f32 %v961_v24, %v937_v34  ;;  %v939_v38 = vsel %vm923_vm12, %v891_v21, %v931_v30  ;;  %v938_v47 = vsel %vm922_vm13, %v878_v20, %v930_v35 }
 0x372   : > { %v971_v44 = vadd.f32 %v963_v25, %v939_v38  ;;  %v970_v51 = vadd.f32 %v962_v45, %v938_v47  ;;  %v941_v55 = vsel %vm925_vm14, %v905_v32, %v933_v48  ;;  %v935_v56 = vmul.f32 0.2, %v919_v46 }
 0x373   : > { %v987_v42 = vsel %vm977_vm11, %v972_v36, -inf  ;;  %v978_v43 = vsel %vm977_vm11, %v969_v37, -inf  ;;  %vm927_vm15 = vcmp.ge.f32.partialorder %v919_v46, 0.0  ;;  %v973_v60 = vadd.f32 %v965_v52, %v941_v55 }
 0x374   : > { %988 = vmax.xlane.f32.xlu1 %v987_v42  ;;  %979 = vmax.xlane.f32.xlu0 %v978_v43  ;;  %v984_v50 = vsel %vm977_vm11, %v971_v44, -inf  ;;  %v981_v59 = vsel %vm977_vm11, %v970_v51, -inf  ;;  %v920_v63 = vadd.f32 %v918_v29, %v913_v58  ;;  %v943_v0 = vsel %vm927_vm15, %v919_v46, %v935_v56 }
 0x375   : > { %v934_v1 = vmul.f32 0.2, %v906_v54  ;;  %vm926_vm0 = vcmp.ge.f32.partialorder %v906_v54, 0.0  ;;  %v990_v3 = vsel %vm977_vm11, %v973_v60, -inf  ;;  %v975_v7 = vadd.f32 %v967_v61, %v943_v0 }
 0x376   : > { %v966_v9 = vmul.f32 1e+30, %v1626_v62  ;;  %v936_v12 = vmul.f32 0.2, %v920_v63  ;;  %vm928_vm1 = vcmp.ge.f32.partialorder %v920_v63, 0.0 }
 0x377   : > { %v942_v11 = vsel %vm926_vm0, %v906_v54, %v934_v1  ;;  %v996_v13 = vsel %vm977_vm11, %v975_v7, -inf  ;;  %v968_v15 = vmul.f32 1e+30, %v1628_v10 }
 0x378   : > { %985 = vmax.xlane.f32.xlu0 %v984_v50  ;;  %v974_v14 = vadd.f32 %v966_v9, %v942_v11  ;;  %v944_v16 = vsel %vm928_vm1, %v920_v63, %v936_v12 }
 0x379   : > { %v976_v18 = vadd.f32 %v968_v15, %v944_v16 }
 0x37a   : > { %v993_v17 = vsel %vm977_vm11, %v974_v14, -inf }
 0x37b   : > { %v999_v19 = vsel %vm977_vm11, %v976_v18, -inf }
 0x37c   : > { %982 = vmax.xlane.f32.xlu0 %v981_v59 }
 0x380   : > { %991 = vmax.xlane.f32.xlu0 %v990_v3 }
 0x384   : > { %997 = vmax.xlane.f32.xlu0 %v996_v13 }
 0x388   : > { %994 = vmax.xlane.f32.xlu0 %v993_v17 }
 0x38c   : > { %1000 = vmax.xlane.f32.xlu0 %v999_v19 }
 0x401   : > { %v980_v20 = vpop.xlane.xlu0 %979  ;;  %v989_v27 = vpop.xlane.xlu1 %988 }
 0x402   : > { %v1002_v21 = vsub.f32 %v937_v34, %v980_v20  ;;  %v1005_v29 = vsub.f32 %v2120_v33, %v989_v27 }
 0x404   : > { %v1010_v22 = vmul.f32 1.442695, %v1002_v21  ;;  %v1016_v41 = vmul.f32 1.442695, %v1005_v29 }
 0x405   : > { %v986_v23 = vpop.xlane.xlu0 %985 }
 0x406   : > { %v1004_v24 = vsub.f32 %v939_v38, %v986_v23  ;;  %1822 = vpow2.f32 %v1010_v22 }
 0x408   : > { %v1014_v25 = vmul.f32 1.442695, %v1004_v24 }
 0x409   : > { %v983_v26 = vpop.xlane.xlu0 %982 }
 0x40a   : > { %1824 = vpow2.f32 %v1014_v25  ;;  %v1003_v28 = vsub.f32 %v938_v47, %v983_v26 }
 0x40c   : > { %v1012_v30 = vmul.f32 1.442695, %v1003_v28 }
 0x40d   : > { %v992_v32 = vpop.xlane.xlu0 %991 }
 0x40e   : > { %v1006_v35 = vsub.f32 %v941_v55, %v992_v32  ;;  %1826 = vpow2.f32 %v1012_v30 }
 0x410   : > { %v1018_v36 = vmul.f32 1.442695, %v1006_v35  ;;  %v1823_v37 = vpop.eup %1822 }
 0x411   : > { %v998_v42 = vpop.xlane.xlu0 %997  ;;  %v1026_v38 = vmul.f32 %v1823_v37, %v2099_v5  ;;  %v1171_v37 = vld [vmem:[%s2306_s7] sm:$0xff] }
 0x412   : > { %1828 = vpow2.f32 %v1018_v36  ;;  %v1008_v34 = vsub.f32 %v943_v0, %v998_v42  ;;  %1738 = vmatprep.mubr.msk.f32.mxu1 %vm1180_vm2, %v1171_v37  ;;  %v1157_v42 = vld [vmem:[%s2305_s6 + $0x10] sm:$0xff] }
 0x413   : > { %v1034_v45 = vsel %vm977_vm11, %v1026_v38, 0.0  ;;  %1830 = vpow2.f32 %v1016_v41 }
 0x414   : > { %v1825_v43 = vpop.eup %1824  ;;  %v1022_v44 = vmul.f32 1.442695, %v1008_v34  ;;  %1035 = vadd.xlane.f32.xlu0 %v1034_v45  ;;  %v1158_v34 = vld [vmem:[%s2305_s6 + $0x18] sm:$0xff] }
 0x415   : > { %v995_v46 = vpop.xlane.xlu0 %994  ;;  %v1028_v33 = vmul.f32 %v1825_v43, %v2104_v6  ;;  %v1155_v43 = vld [vmem:[%s2305_s6] sm:$0xff] }
 0x416   : > { %1832 = vpow2.f32 %v1022_v44  ;;  %v1007_v47 = vsub.f32 %v942_v11, %v995_v46  ;;  %v1156_v44 = vld [vmem:[%s2305_s6 + $0x8] sm:$0xff] }
 0x417   : > { %v1040_v48 = vsel %vm977_vm11, %v1028_v33, 0.0 }
 0x418   : > { %v1020_v50 = vmul.f32 1.442695, %v1007_v47  ;;  %1041 = vadd.xlane.f32.xlu0 %v1040_v48  ;;  %v1827_v53 = vpop.eup %1826 }
 0x419   : > { %v1001_v51 = vpop.xlane.xlu0 %1000  ;;  %v1027_v6 = vmul.f32 %v1827_v53, %v2109_v8 }
 0x41a   : > { %1834 = vpow2.f32 %v1020_v50  ;;  %v1009_v52 = vsub.f32 %v944_v16, %v1001_v51 }
 0x41b   : > { %v1037_v61 = vsel %vm977_vm11, %v1027_v6, 0.0 }
 0x41c   : > { %v1829_v5 = vpop.eup %1828  ;;  %v1024_v54 = vmul.f32 1.442695, %v1009_v52 }
 0x41d   : > { %v1030_v55 = vmul.f32 %v1829_v5, %v2118_v31  ;;  %v1831_v56 = vpop.eup %1830  ;;  %v1161_v5 = vld [vmem:[%s2305_s6 + $0x30] sm:$0xff] }
 0x41e   : > { %1836 = vpow2.f32 %v1024_v54  ;;  %v1029_v63 = vmul.f32 %v1831_v56, %v2094_v4  ;;  %v1162_v54 = vld [vmem:[%s2305_s6 + $0x38] sm:$0xff]  ;;  %v1159_v56 = vld [vmem:[%s2305_s6 + $0x20] sm:$0xff] }
 0x41f   : > { %v1046_v58 = vsel %vm977_vm11, %v1030_v55, 0.0 }
 0x420   : > { %v1833_v59 = vpop.eup %1832  ;;  %1047 = vadd.xlane.f32.xlu0 %v1046_v58  ;;  %v1043_v31 = vsel %vm977_vm11, %v1029_v63, 0.0  ;;  %v1160_v58 = vld [vmem:[%s2305_s6 + $0x28] sm:$0xff] }
 0x421   : > { %v1032_v60 = vmul.f32 %v1833_v59, %v2129_v49 }
 0x423   : > { %v1052_v62 = vsel %vm977_vm11, %v1032_v60, 0.0 }
 0x424   : > { %v1835_v0 = vpop.eup %1834  ;;  %1038 = vadd.xlane.f32.xlu0 %v1037_v61  ;;  %1053 = vadd.xlane.f32.xlu1 %v1052_v62 }
 0x425   : > { %v1031_v1 = vmul.f32 %v1835_v0, %v2136_v57 }
 0x427   : > { %v1049_v8 = vsel %vm977_vm11, %v1031_v1, 0.0 }
 0x428   : > { %v1837_v3 = vpop.eup %1836  ;;  %1044 = vadd.xlane.f32.xlu0 %v1043_v31 }
 0x429   : > { %v1033_v7 = vmul.f32 %v1837_v3, %v2143_v2  ;;  %v1633_v3 = vld [vmem:[%s592_s30] ss:$0 sm:$0xff] }
 0x42b   : > { %v1055_v49 = vsel %vm977_vm11, %v1033_v7, 0.0 }
 0x42c   : > { %1050 = vadd.xlane.f32.xlu0 %v1049_v8 }
 0x430   : > { %1056 = vadd.xlane.f32.xlu0 %v1055_v49 }
 0x4a1   : > { %v1036_v9 = vpop.xlane.xlu0 %1035 }
 0x4a2   : > { %1838 = vrcp.f32 %v1036_v9 }
 0x4a5   : > { %v1042_v10 = vpop.xlane.xlu0 %1041 }
 0x4ac   : > { %v1839_v14 = vpop.eup %1838 }
 0x4ad   : > { %v1048_v4 = vpop.xlane.xlu0 %1047  ;;  %v1066_v17 = vmul.f32 %v1839_v14, %v1026_v38 }
 0x4b1   : > { %v1039_v11 = vpop.xlane.xlu0 %1038  ;;  %v1054_v57 = vpop.xlane.xlu1 %1053 }
 0x4b2   : > { %1840 = vrcp.f32 %v1039_v11 }
 0x4b3   : > { %1842 = vrcp.f32 %v1042_v10 }
 0x4b5   : > { %v1045_v12 = vpop.xlane.xlu0 %1044 }
 0x4b6   : > { %1844 = vrcp.f32 %v1045_v12 }
 0x4b7   : > { %1846 = vrcp.f32 %v1048_v4 }
 0x4b9   : > { %v1051_v13 = vpop.xlane.xlu0 %1050 }
 0x4ba   : > { %1848 = vrcp.f32 %v1051_v13 }
 0x4bb   : > { %1850 = vrcp.f32 %v1054_v57 }
 0x4bc   : > { %v1841_v2 = vpop.eup %1840 }
 0x4bd   : > { %v1057_v15 = vpop.xlane.xlu0 %1056  ;;  %v1843_v16 = vpop.eup %1842  ;;  %v1067_v18 = vmul.f32 %v1841_v2, %v1027_v6 }
 0x4be   : > { %1852 = vrcp.f32 %v1057_v15  ;;  %v1068_v21 = vmul.f32 %v1843_v16, %v1028_v33 }
 0x4bf   : > { %v1074_v20 = vpack.c.bf16 %v1067_v18, %v1066_v17 }
 0x4c0   : > { %v1845_v19 = vpop.eup %1844 }
 0x4c1   : > { %v1069_v22 = vmul.f32 %v1845_v19, %v1029_v63  ;;  %v1847_v23 = vpop.eup %1846  ;;  %1714 = vmatprep.mubr.msk.bf16.mxu0 %vm977_vm11, %v1074_v20 }
 0x4c2   : > { %v1070_v26 = vmul.f32 %v1847_v23, %v1030_v55 }
 0x4c3   : > { %v1075_v24 = vpack.c.bf16 %v1069_v22, %v1068_v21 }
 0x4c4   : > { %v1849_v25 = vpop.eup %1848 }
 0x4c5   : > { %1715 = vmatmul.mubr.msk.bf16.vlgmr.msra.gmra.mrb[4].mxu0 %vm977_vm11, %v1075_v24  ;;  %v1071_v27 = vmul.f32 %v1849_v25, %v1031_v1  ;;  %v1851_v28 = vpop.eup %1850  ;;  %v1172_v1 = vld [vmem:[%s2306_s7 + $0x8] sm:$0xff] }
 0x4c6   : > { %v1072_v32 = vmul.f32 %v1851_v28, %v1032_v60 }
 0x4c7   : > { %v1076_v29 = vpack.c.bf16 %v1071_v27, %v1070_v26  ;;  %v1636_v26 = vld [vmem:[%s595_s25] ss:$0 sm:$0xff] }
 0x4c8   : > { %v1853_v30 = vpop.eup %1852 }
 0x4c9   : > { %1718 = vmatprep.mubr.msk.bf16.mxu0 %vm977_vm11, %v1076_v29  ;;  %v1073_v35 = vmul.f32 %v1853_v30, %v1033_v7  ;;  %v1637_v29 = vld [vmem:[%s598_s9] ss:$0 sm:$0xff] }
 0x4cb   : > { %v1077_v36 = vpack.c.bf16 %v1073_v35, %v1072_v32 }
 0x4cd   : > { %1719 = vmatmul.mubr.msk.bf16.gmra.mrb[8].mxu0 %vm977_vm11, %v1077_v36 }
 0x598   : > { %v1716_v41 = vpop.f32.mrb[4].mxu0 }
 0x599   : > { %v1124_v38 = vpop.f32.mrb[5].mxu0  ;;  %v1165_v46 = vmul.f32 %v1716_v41, %v1157_v42 }
 0x59a   : > { %v1717_v45 = vpop.f32.mrb[6].mxu0  ;;  %v1163_v48 = vmul.f32 %v1155_v43, %v1124_v38  ;;  %v1318_v43 = vld [vmem:[%s2307_s8] sm:$0xff] (!%p1638_p5) }
 0x59b   : > { %v1166_v33 = vmul.f32 %v1717_v45, %v1158_v34  ;;  %v1127_v47 = vpop.f32.mrb[7].mxu0 }
 0x59c   : > { %v1164_v50 = vmul.f32 %v1156_v44, %v1127_v47  ;;  %v1916_v44 = vmov (!%p1638_p5), 0.0  }
 0x59d   : > { %v1764_v51 = vpack.c.bf16 %v1166_v33, %v1165_v46  ;;  %1741 = vmatprep.subr.bf16.mxu0 (!%p1638_p5), %v1916_v44  ;;  %v1321_v46 = vld [vmem:[%s2307_s8 + $0x18] sm:$0xff] (!%p1638_p5)  ;;  %1745 = vmatprep.mubr.msk.bf16.mxu0 (!%p1638_p5), %vm1917_vm3, %v1916_v44 }
 0x59e   : > { %v1760_v52 = vpack.c.bf16 %v1164_v50, %v1163_v48  ;;  %v1377_v48 = vld [vmem:[%s2309_s10] sm:$0xff] (!%p1638_p5)  ;;  %v1378_v50 = vld [vmem:[%s2309_s10 + $0x8] sm:$0xff] (!%p1638_p5) }
 0x5a0   : > { %v1720_v53 = vpop.f32.mrb[8].mxu0  ;;  %1761 = vmatprep.subr.bf16.mxu1 %v1760_v52 }
 0x5a1   : > { %v1140_v55 = vpop.f32.mrb[9].mxu0  ;;  %1763 = vmatpush3.bf16.msra.mxu1 %v1760_v52  ;;  %v1169_v59 = vmul.f32 %v1720_v53, %v1161_v5  ;;  %v1776_v52 = vpack.c.bf16 (!%p1638_p5), %v1378_v50, %v1377_v48  ;;  %v1380_v53 = vld [vmem:[%s2309_s10 + $0x18] sm:$0xff] (!%p1638_p5) }
 0x5a2   : > { %v1721_v6 = vpop.f32.mrb[10].mxu0  ;;  %1765 = vmatprep.subr.bf16.mxu1 %v1764_v51  ;;  %v1167_v62 = vmul.f32 %v1159_v56, %v1140_v55 }
 0x5a3   : > { %v1170_v60 = vmul.f32 %v1721_v6, %v1162_v54  ;;  %v1143_v61 = vpop.f32.mrb[11].mxu0  ;;  %v1639_v54 = vld [vmem:[%s2328_s17] ss:$0 sm:$0xff] (!%p1638_p5) }
 0x5a4   : > { %v1168_v63 = vmul.f32 %v1160_v58, %v1143_v61 }
 0x5a5   : > { %v1772_v0 = vpack.c.bf16 %v1170_v60, %v1169_v59  ;;  %1767 = vmatpush3.bf16.msra.mxu1 %v1764_v51  ;;  %v1379_v51 = vld [vmem:[%s2309_s10 + $0x10] sm:$0xff] (!%p1638_p5) }
 0x5a6   : > { %v1768_v31 = vpack.c.bf16 %v1168_v63, %v1167_v62  ;;  %v1780_v5 = vpack.c.bf16 (!%p1638_p5), %v1380_v53, %v1379_v51  ;;  %v1918_v63 = vmov (!%p1638_p5), 0  }
 0x5a7   : > { %1858 = vset.pattern.permute.xlu0 (!%p1638_p5), %v1918_v63 }
 0x5a8   : > { %1769 = vmatprep.subr.bf16.mxu1 %v1768_v31 }
 0x5a9   : > { %1771 = vmatpush3.bf16.msra.mxu1 %v1768_v31 }
 0x5aa   : > { %1773 = vmatprep.subr.bf16.mxu1 %v1772_v0 }
 0x5ad   : > { %1775 = vmatpush3.bf16.msra.mxu1 %v1772_v0  ;;  %v1641_v0 = vld [vmem:[#allocation3] ss:$0 sm:$0xff] (!%p1638_p5) }
 0x5ae   : > { %1777 = vmatprep.subr.bf16.mxu1 (!%p1638_p5), %v1776_v52 }
 0x5b0   : > { %1739 = vmatmul.mubr.msk.f32.vlgmr.msra.gmra.mrb[4].mxu1 %vm1180_vm2, %v1172_v1 }
 0x5b1   : > { %1779 = vmatpush3.bf16.msra.mxu1 (!%p1638_p5), %v1776_v52 }
 0x5b2   : > { %1781 = vmatprep.subr.bf16.mxu1 (!%p1638_p5), %v1780_v5 }
 0x5b5   : > { %1783 = vmatpush3.bf16.msra.mxu1 (!%p1638_p5), %v1780_v5 }
 0x683   : > { %v1740_v8 = vpop.f32.mrb[4].mxu1 }
 0x684   : > { %v1259_v7 = vadd.f32 %v1740_v8, %v1633_v3  ;;  %v1253_v49 = vpop.f32.mrb[5].mxu1 }
 0x685   : > { %v1254_v9 = vadd.f32 %v1633_v3, %v1253_v49 }
 0x686   : > { %v1265_v10 = vsel %vm735_vm8, %v1259_v7, 0.0 }
 0x687   : > { %1266 = vadd.xlane.f32.xlu0 %v1265_v10  ;;  %v1262_v4 = vsel %vm735_vm8, %v1254_v9, 0.0 }
 0x688   : > { %1263 = vadd.xlane.f32.xlu1 %v1262_v4 }
 0x714   : > { %v1267_v11 = vpop.xlane.xlu0 %1266 }
 0x715   : > { %v1270_v12 = vmul.f32 0.03125, %v1267_v11  ;;  %v1264_v57 = vpop.xlane.xlu1 %1263 }
 0x716   : > { %v1269_v13 = vmul.f32 0.03125, %v1264_v57 }
 0x717   : > { %v1272_v14 = vsub.f32 %v1259_v7, %v1270_v12 }
 0x718   : > { %v1271_v2 = vsub.f32 %v1254_v9, %v1269_v13 }
 0x719   : > { %v1274_v15 = vmul.f32 %v1272_v14, %v1272_v14 }
 0x71a   : > { %v1273_v16 = vmul.f32 %v1271_v2, %v1271_v2 }
 0x71b   : > { %v1278_v17 = vsel %vm735_vm8, %v1274_v15, 0.0 }
 0x71c   : > { %1279 = vadd.xlane.f32.xlu0 %v1278_v17  ;;  %v1275_v18 = vsel %vm735_vm8, %v1273_v16, 0.0 }
 0x71d   : > { %1276 = vadd.xlane.f32.xlu1 %v1275_v18 }
 0x7a9   : > { %v1280_v19 = vpop.xlane.xlu0 %1279 }
 0x7aa   : > { %v1282_v20 = vmul.f32 0.03125, %v1280_v19  ;;  %v1277_v21 = vpop.xlane.xlu1 %1276 }
 0x7ab   : > { %v1281_v22 = vmul.f32 0.03125, %v1277_v21 }
 0x7ac   : > { %v1284_v23 = vadd.f32 1e-05, %v1282_v20 }
 0x7ad   : > { %v1283_v24 = vadd.f32 1e-05, %v1281_v22 }
 0x7ae   : > { %1854 = vrsqrt.f32 %v1284_v23 }
 0x7af   : > { %1856 = vrsqrt.f32 %v1283_v24 }
 0x7b8   : > { %v1855_v25 = vpop.eup %1854 }
 0x7b9   : > { %v1857_v27 = vpop.eup %1856  ;;  %v1288_v28 = vmul.f32 %v1855_v25, %v1272_v14 }
 0x7ba   : > { %v1287_v30 = vmul.f32 %v1857_v27, %v1271_v2 }
 0x7bb   : > { %v1297_v32 = vmul.f32 %v1636_v26, %v1288_v28 }
 0x7bc   : > { %v1296_v35 = vmul.f32 %v1636_v26, %v1287_v30 }
 0x7bd   : > { %v1306_v36 = vadd.f32 %v1637_v29, %v1297_v32 }
 0x7be   : > { %v1305_v37 = vadd.f32 %v1637_v29, %v1296_v35  ;;  %1316 = sbr.rel (%p1638_p5) target bundleno = 2647 (0xa57), region = 96 }
 0x7bf   : > { %v1308_v41 = vadd.f32 %v1306_v36, %v2083_v40  ;;  %v1320_v40 = vld [vmem:[%s2307_s8 + $0x10] sm:$0xff] (!%p1638_p5) }
 0x7c0   : > { %v1307_v42 = vadd.f32 %v1305_v37, %v2081_v39  ;;  %v1319_v39 = vld [vmem:[%s2307_s8 + $0x8] sm:$0xff] (!%p1638_p5)  ;;  %v1323_v33 = vpack.c.bf16 (!%p1638_p5), %v1321_v46, %v1320_v40 }
 0x7c1   : > { %v2224_v34 = vmax.f32 %v1308_v41, 0.0  ;;  %v1322_v45 = vpack.c.bf16 (!%p1638_p5), %v1319_v39, %v1318_v43 }
 0x7c2   : > { %v2226_v38 = vmax.f32 %v1307_v42, 0.0 }
 0x7c3   : > { %1312 = vst.msk [vmem:[#allocation2 + $0x8] sm:$0xff] %vm735_vm8, %v2224_v34  ;;  %1742 = vmatpush3.bf16.msra.mxu0 (!%p1638_p5), %v1322_v45 }
 0x7c4   : > { %1311 = vst.msk [vmem:[#allocation2] sm:$0xff] %vm735_vm8, %v2226_v38  ;;  %1743 = vmatprep.subr.bf16.mxu0 (!%p1638_p5), %v1916_v44  ;;  %v1317_v47 = vpack.c.bf16 (!%p1638_p5), %v2224_v34, %v2226_v38 }
 0x7c7   : > { %1744 = vmatpush3.bf16.msra.mxu0 %v1323_v33 }
 0x7ca   : > { %1746 = vmatmul.mubr.msk.bf16.vlgmr.msra.gmra.mrb[0].mxu0 %vm735_vm8, %v1317_v47 }
 0x89d   : > { %v1368_v55 = vpop.f32.mrb[0].mxu0 }
 0x89e   : > { %v1369_v56 = vadd.f32 %v1639_v54, %v1368_v55  ;;  %v1747_v58 = vpop.f32.mrb[1].mxu0 }
 0x89f   : > { %v1371_v6 = vpop.f32.mrb[2].mxu0 }
 0x8a0   : > { %1859 = vtanh.f32 %v1369_v56  ;;  %v1372_v59 = vadd.f32 %v1639_v54, %v1371_v6  ;;  %v1748_v60 = vpop.f32.mrb[3].mxu0 }
 0x8a2   : > { %1861 = vtanh.f32 %v1372_v59 }
 0x8aa   : > { %v1860_v61 = vpop.eup %1859 }
 0x8ab   : > { %1757 = vmatprep.mubr.msk.f32.mxu1 %vm735_vm8, %v1860_v61 }
 0x8ac   : > { %v1862_v62 = vpop.eup %1861 }
 0x8ad   : > { %1758 = vmatmul.mubr.msk.f32.vlgmr.msra.gmra.mrb[0].mxu1 %vm735_vm8, %v1862_v62 }
 0x980   : > { %v1759_v31 = vpop.f32.mrb[0].mxu1 }
 0x981   : > { %v1466_v1 = vadd.f32 %v1759_v31, %v1641_v0  ;;  %v1460_v3 = vpop.f32.mrb[1].mxu1 }
 0x982   : > { %v1461_v8 = vadd.f32 %v1641_v0, %v1460_v3 }
 0x983   : > { %v1471_v7 = vsel %vm1469_vm4, %v1466_v1, -inf }
 0x984   : > { %v1470_v49 = vsel %vm1469_vm4, %v1461_v8, -inf }
 0x985   : > { %v1472_v9 = vmax.f32 %v1470_v49, %v1471_v7 }
 0x987   : > { %v1473_v10 = vrot.slane %v1472_v9, 4 }
 0x989   : > { %v1474_v4 = vmax.f32 %v1472_v9, %v1473_v10 }
 0x98b   : > { %v1475_v11 = vrot.slane %v1474_v4, 2 }
 0x98d   : > { %v1476_v12 = vmax.f32 %v1474_v4, %v1475_v11 }
 0x98f   : > { %v1477_v57 = vrot.slane %v1476_v12, 1 }
 0x991   : > { %v1478_v13 = vmax.f32 %v1476_v12, %v1477_v57 }
 0x993   : > { %v1479_v14 = vsub.f32 %v1461_v8, %v1478_v13  ;;  %v1480_v2 = vsub.f32 %v1466_v1, %v1478_v13 }
 0x995   : > { %v1481_v15 = vmul.f32 1.442695, %v1479_v14  ;;  %v1483_v16 = vmul.f32 1.442695, %v1480_v2 }
 0x997   : > { %1863 = vpow2.f32 %v1481_v15 }
 0x998   : > { %1865 = vpow2.f32 %v1483_v16 }
 0x9a1   : > { %v1864_v17 = vpop.eup %1863 }
 0x9a2   : > { %v1866_v18 = vpop.eup %1865  ;;  %v1485_v19 = vsel %vm1469_vm4, %v1864_v17, 0.0 }
 0x9a3   : > { %v1486_v20 = vsel %vm1469_vm4, %v1866_v18, 0.0 }
 0x9a4   : > { %v1487_v21 = vadd.f32 %v1486_v20, %v1485_v19 }
 0x9a6   : > { %v1488_v22 = vrot.slane %v1487_v21, 4 }
 0x9a8   : > { %v1489_v23 = vadd.f32 %v1488_v22, %v1487_v21 }
 0x9aa   : > { %v1490_v24 = vrot.slane %v1489_v23, 2 }
 0x9ac   : > { %v1491_v25 = vadd.f32 %v1490_v24, %v1489_v23 }
 0x9ae   : > { %v1492_v26 = vrot.slane %v1491_v25, 1 }
 0x9b0   : > { %v1493_v27 = vadd.f32 %v1492_v26, %v1491_v25 }
 0x9b2   : > { %1867 = vrcp.f32 %v1493_v27 }
 0x9bc   : > { %v1868_v28 = vpop.eup %1867 }
 0x9bd   : > { %v1495_v29 = vmul.f32 %v1868_v28, %v1864_v17  ;;  %v1496_v30 = vmul.f32 %v1868_v28, %v1866_v18 }
 0x9bf   : > { %v1497_v32 = vadd.f32 0.0625, %v1495_v29  ;;  %v1498_v35 = vadd.f32 0.0625, %v1496_v30 }
 0x9c1   : > { %1501 = vperm.xlu0 %1858, %v1497_v32  }
 0x9c5   : > { %1506 = vperm.xlu0 %1858, %v1498_v35  }
 0xa40   : > { %v1502_v36 = vpop.permute.xlu0 %1501 }
 0xa41   : > { %v1509_v37 = vmul.f32 %v1502_v36, %v2226_v38 }
 0xa43   : > { %v1511_v43 = vsel %vm735_vm8, %v1509_v37, 0.0 }
 0xa44   : > { %v1507_v41 = vpop.permute.xlu0 %1506 }
 0xa45   : > { %v1510_v42 = vmul.f32 %v1507_v41, %v2224_v34 }
 0xa47   : > { %v1512_v39 = vsel %vm735_vm8, %v1510_v42, 0.0 }
 0xa48   : > { %v1513_v40 = vadd.f32 %v1512_v39, %v1511_v43 }
 0xa4a   : > { %v1514_v44 = vrot.slane %v1513_v40, 4 }
 0xa4c   : > { %v1515_v45 = vadd.f32 %v1514_v44, %v1513_v40 }
 0xa4e   : > { %v1516_v46 = vrot.slane %v1515_v45, 2 }
 0xa50   : > { %v1517_v33 = vadd.f32 %v1516_v46, %v1515_v45 }
 0xa52   : > { %v1518_v47 = vrot.slane %v1517_v33, 1 }
 0xa54   : > { %v1519_v48 = vadd.f32 %v1518_v47, %v1517_v33 }
 0xa56   : > { %1521 = vst.msk [vmem:[#allocation4] sm:$0x1] %vm1520_vm5, %v1519_v48 }
 0xa57 PF: > { %p1792_p6 = scmp.eq.s32.totalorder %s2019_s27, 1  ;;  %s1919_s26 = smov [#allocation4]  }
 0xa58   : > { %s1529_s28 = sshll.u32 %s1919_s26, 4  ;;  %s1530_s28 = int_to_ptr.vmem [resolvable:$true] %s1529_s28 }
 0xa59   : > { %s1869_s1 = scalar_lea.vmem %s1530_s28, 16  ;;  %s1875_s22 = scalar_lea.vmem %s1530_s28, 32 }
 0xa5a   : > { %p1870_p7 = scmp.ne.s32.totalorder %s1530_s28, %s1869_s1  ;;  %p1876_p10 = scmp.lt.s32.totalorder %s1530_s28, %s1530_s28 }
 0xa5b   : > { %p1877_p11 = scmp.lt.s32.totalorder %s1875_s22, %s1869_s1 }
 0xa5c   : > { %p1871_p8 = pnand %p1870_p7, %p1792_p6 }
 0xa5d   : > { %p1878_p12 = por %p1877_p11, %p1876_p10 }
 0xa5e   : > { %p1872_p9 = pneg %p1871_p8 }
 0xa60   : > { %p1879_p13 = pnand %p1878_p12, %p1872_p9 }
 0xa62   : > { %1882 = shalt.err (!%p1879_p13)
}
 0xa63   : > { %s2329_s29 = sld [smem:[#allocation11_spill]] }
 0xa69   : > { %s1883_s30 = scalar_lea.hbm %s2329_s29, 16 }
 0xa6a   : > { %p1884_p0 = scmp.ne.s32.totalorder %s2329_s29, %s1883_s30  ;;  %p1889_p3 = scmp.lt.u32.totalorder %s1883_s30, %s2329_s29 }
 0xa6c   : > { %p1885_p1 = pnand %p1884_p0, %p1792_p6 }
 0xa6e   : > { %p1886_p2 = pneg %p1885_p1 }
 0xa70   : > { %p1891_p4 = pnand %p1889_p3, %p1886_p2 }
 0xa72   : > { %1894 = shalt.err (!%p1891_p4)
}
 0xa73   : > { %1789 = dma.vmem_to_hbm [thread:$0]  (%p1792_p6), %s1530_s28, 16, %s2329_s29, [#allocation5]  }
 0xa74   : > { %1900 = dma.done.wait (%p1792_p6), [#allocation5], 16  }
 0xa75   : > { %1902 = vsyncadd (%p1792_p6), [#allocation5], 4294967280 }
 0xa76 PF: > { %s2330_s17 = sld [smem:[#allocation7_spill]] }
 0xa7c   : > { %s30_s26 = sadd.s32 1, %s2330_s17  }
 0xa7d   : > { %p27_p5 = scmp.ge.s32.totalorder %s30_s26, 4  }
 0xa7f   :  { %29 = sbr.rel (!%p27_p5) target bundleno = 6 (0x6), region = 135 }
 0xa86   :  { %1542 = vsyncpa [#allocation5], 1 }
 0xa87   :  { %1544 = vsyncpa [#allocation5 + $0x1], 1 }

</bundles_post_ra>
